<compile_context>
chip_gen: v6e
topology: v6e:2x2x1
jax: 0.10.0
libtpu: 0.0.40
codegen_flags: <defaults>
</compile_context>

<pallas_src>
import functools

import jax
import jax.numpy as jnp
from jax.experimental import pallas as pl
from jax.experimental.pallas import tpu as pltpu


# ----------------------------- fused kernel ---------------------------------

def _fused_mlp_kernel(*refs, num_layers, compute_dtype):
    """refs = (x_ref, w0_ref, b0_ref, ..., w_{L-1}_ref, b_{L-1}_ref, o_ref).

    For one batch tile:
        h = x
        for hidden layers: h = relu(h @ W + b)         (f32 epilogue)
        logits = h @ W_last + b_last                   (padded lanes get -inf
                                                        via the pre-baked bias)
        o = softmax(logits, axis=1)
    """
    x_ref = refs[0]
    o_ref = refs[-1]
    param_refs = refs[1:-1]

    h = x_ref[...]
    for i in range(num_layers):
        w = param_refs[2 * i][...]
        b = param_refs[2 * i + 1][...]          # (1, out_pad) f32, broadcasts
        y = jnp.dot(h.astype(compute_dtype), w,
                    preferred_element_type=jnp.float32) + b
        if i < num_layers - 1:
            h = jnp.maximum(y, 0.0)             # ReLU (f32)
        else:
            # Padded logit lanes are already -inf (baked into the bias pad).
            m = jnp.max(y, axis=1, keepdims=True)
            e = jnp.exp(y - m)
            denom = jnp.sum(e, axis=1, keepdims=True)
            o_ref[...] = e * pl.reciprocal(denom)   # exact -> rows sum to 1
    # TODO(synk): for very wide hidden layers, chunk each matmul over 256/512
    # lane slices of W (pl.ds) and/or add a K-reduction grid axis with a VMEM
    # accumulator; on v7x consider fp8 weight storage with per-channel scales.


# ----------------------------- helpers ---------------------------------------

_LANE = 128   # lane width (last-dim padding granularity)


def _round_up(n, m):
    return ((n + m - 1) // m) * m


def _sublane(dtype):
    # Packed sublane granularity: 8 for f32, 16 for bf16, 32 for int8/fp8.
    return max(8, 32 // jnp.dtype(dtype).itemsize)


# ----------------------------- param preparation -----------------------------

def prepare_mlp_params(params, compute_dtype=jnp.bfloat16):
    """Pad + cast parameters ONCE, outside the jitted forward.

    params: tuple of (W (in, out) f32, b (1, out) f32).
    Returns (flat_params, out_dim) where flat_params = (W0, b0, W1, b1, ...):
      * Wi zero-padded to lane multiples of 128 and cast to compute_dtype,
      * bi kept f32, padded to (1, out_pad); the LAST bias's padded lanes are
        -inf so the in-kernel softmax ignores them without an explicit mask
        (only applied when out_pad > out_dim, so no all--inf rows).
    """
    num_layers = len(params)
    flat = []
    in_pad = _round_up(params[0][0].shape[0], _LANE)
    for i, (w, b) in enumerate(params):
        fan_in, fan_out = w.shape
        o_pad = _round_up(fan_out, _LANE)
        w_p = jnp.pad(w.astype(jnp.float32),
                      ((0, in_pad - fan_in), (0, o_pad - fan_out))
                      ).astype(compute_dtype)
        b_f = b.astype(jnp.float32).reshape(1, -1)
        pad_val = -jnp.inf if (i == num_layers - 1 and o_pad > fan_out) else 0.0
        b_p = jnp.pad(b_f, ((0, 0), (0, o_pad - fan_out)),
                      constant_values=pad_val)
        flat += [w_p, b_p]
        in_pad = o_pad
    return tuple(flat), params[-1][0].shape[1]


# ----------------------------- forward ---------------------------------------

@functools.partial(jax.jit, static_argnames=("out_dim", "compute_dtype"))
def mlp_forward(x, flat_params, *, out_dim, compute_dtype=jnp.bfloat16):
    """x: (N, C, H, W) -> softmax probabilities (N, out_dim).

    flat_params: pre-padded / pre-cast params from prepare_mlp_params.
    """
    n = x.shape[0]
    h = x.reshape(n, -1)                         # x.view(x.size(0), -1)
    num_layers = len(flat_params) // 2
    k_pad = flat_params[0].shape[0]              # padded input features
    out_pad = flat_params[-1].shape[1]           # padded output features

    # ---- batch tile: sublane-aligned to compute_dtype, up to 256 rows ----
    sub = _sublane(compute_dtype)
    tm = min(256, _round_up(max(n, sub), sub))
    n_pad = _round_up(n, tm)
    # NOTE: a grid with >= 2 steps lets the "parallel" axis shard across v7x's
    # two TensorCores; with tm<=256 that happens automatically once n > 256.

    # Pad/cast the activations only when actually needed (avoid extra HBM copy).
    if h.shape != (n_pad, k_pad):
        h = jnp.pad(h, ((0, n_pad - n), (0, k_pad - h.shape[1])))
    x_p = h.astype(compute_dtype)

    # ---- block specs ----
    grid = (n_pad // tm,)
    x_spec = pl.BlockSpec((tm, k_pad), lambda i: (i, 0))
    out_spec = pl.BlockSpec((tm, out_pad), lambda i: (i, 0))
    # Resident params: constant index_map + single buffering (no double-buffer
    # waste on weights that never change across the grid).
    param_specs = [
        pl.BlockSpec(p.shape, lambda i: (0, 0), pipeline_mode=pl.Buffered(1))
        for p in flat_params
    ]

    # ---- VMEM budget (per TensorCore): single-buffered params,
    #      double-buffered activation tiles, f32 intermediates + headroom.
    itemsize = jnp.dtype(compute_dtype).itemsize
    param_bytes = sum(int(p.size) * p.dtype.itemsize for p in flat_params)
    widest = max([k_pad] + [p.shape[-1] for p in flat_params[0::2]])
    act_bytes = 2 * tm * k_pad * itemsize + 2 * tm * out_pad * 4
    inter_bytes = 2 * tm * widest * 4
    vmem_limit = int(min(64 << 20,                              # v7x physical/TC
                         max(16 << 20,
                             int(1.25 * (param_bytes + act_bytes + inter_bytes))
                             + (4 << 20))))
    # TODO(synk): once the budget above approaches ~48 MiB (v7x), switch to a
    # tiled-weight path (grid over out-features / K with pl.when accumulator)
    # instead of resident whole weights.

    kernel = functools.partial(
        _fused_mlp_kernel,
        num_layers=num_layers,
        compute_dtype=compute_dtype,
    )

    out_p = pl.pallas_call(
        kernel,
        out_shape=jax.ShapeDtypeStruct((n_pad, out_pad), jnp.float32),
        grid=grid,
        in_specs=[x_spec] + param_specs,
        out_specs=out_spec,
        compiler_params=pltpu.CompilerParams(
            dimension_semantics=("parallel",),   # batch tiles across TCs (v7x)
            vmem_limit_bytes=vmem_limit,
        ),
    )(x_p, *flat_params)

    # Strip batch / lane padding outside the kernel (cheap XLA slice).
    return out_p[:n, :out_dim]


# ----------------------------- params / reference ----------------------------

def init_mlp_params(key, layer_sizes):
    """Deterministic synthetic parameters: W_i (in, out), b_i (1, out)."""
    params = []
    for i in range(len(layer_sizes) - 1):
        fan_in, fan_out = layer_sizes[i], layer_sizes[i + 1]
        key, wk, bk = jax.random.split(key, 3)
        bound = 1.0 / jnp.sqrt(jnp.float32(fan_in))
        w = jax.random.uniform(wk, (fan_in, fan_out), jnp.float32, -bound, bound)
        b = jax.random.uniform(bk, (1, fan_out), jnp.float32, -bound, bound)
        params.append((w, b))
    return params


def mlp_reference(x, params):
    """Pure-JAX f32 reference matching the PyTorch module."""
    h = x.reshape(x.shape[0], -1).astype(jnp.float32)
    for i, (w, b) in enumerate(params):
        h = h @ w + b
        if i < len(params) - 1:
            h = jnp.maximum(h, 0.0)
    return jax.nn.softmax(h, axis=1)


# ----------------------------- main ------------------------------------------

if __name__ == "__main__":
    key = jax.random.PRNGKey(0)
    k_x, k_p = jax.random.split(key)

    # Small NCHW input: batch=2, channels=4, spatial=4x4 -> 64 flat features.
    x = jax.random.normal(k_x, (2, 4, 4, 4), jnp.float32)

    layer_sizes = [64, 32, 16]
    params = tuple(init_mlp_params(k_p, layer_sizes))

    # One-time param padding/cast (hoisted out of the forward path).
    flat_params, out_dim = prepare_mlp_params(params, compute_dtype=jnp.bfloat16)

    out = mlp_forward(x, flat_params, out_dim=out_dim,
                      compute_dtype=jnp.bfloat16)
    out = jax.block_until_ready(out)

    ref = mlp_reference(x, params)

    # Sanity checks: shape, rows sum to 1 (softmax over dim=1), matches f32 ref
    # to bf16-MXU tolerance.
    assert out.shape == (2, layer_sizes[-1])
    assert jnp.allclose(jnp.sum(out, axis=1), 1.0, atol=1e-3)
    assert jnp.allclose(out, ref, rtol=5e-2, atol=5e-3)

    print("KERNEL_OK")
</pallas_src>

<mosaic_0001>
module attributes {stable_mosaic.version = 11 : i64} {
  func.func @_fused_mlp_kernel(%arg0: i32, %arg1: memref<16x128xbf16, #tpu.memory_space<vmem>>, %arg2: memref<128x128xbf16, #tpu.memory_space<vmem>>, %arg3: memref<1x128xf32, #tpu.memory_space<vmem>>, %arg4: memref<128x128xbf16, #tpu.memory_space<vmem>>, %arg5: memref<1x128xf32, #tpu.memory_space<vmem>>, %arg6: memref<16x128xf32, #tpu.memory_space<vmem>>) attributes {dimension_semantics = [#tpu.dimension_semantics<parallel>], iteration_bounds = array<i64: 1>, scalar_prefetch = 0 : i64, scratch_operands = 0 : i64, tpu.core_type = #tpu.core_type<tc>, window_params = [{transform_indices = @transform_0, window_bounds = array<i64: 16, 128>}, {pipeline_mode = #tpu.pipeline_mode<synchronous>, transform_indices = @transform_1, window_bounds = array<i64: 128, 128>}, {pipeline_mode = #tpu.pipeline_mode<synchronous>, transform_indices = @transform_2, window_bounds = array<i64: 1, 128>}, {pipeline_mode = #tpu.pipeline_mode<synchronous>, transform_indices = @transform_3, window_bounds = array<i64: 128, 128>}, {pipeline_mode = #tpu.pipeline_mode<synchronous>, transform_indices = @transform_4, window_bounds = array<i64: 1, 128>}, {transform_indices = @transform_5, window_bounds = array<i64: 16, 128>}]} {
    %c0 = arith.constant 0 : index
    %c0_0 = arith.constant 0 : index
    %0 = vector.load %arg1[%c0, %c0_0] : memref<16x128xbf16, #tpu.memory_space<vmem>>, vector<16x128xbf16>
    %c0_1 = arith.constant 0 : index
    %c0_2 = arith.constant 0 : index
    %1 = vector.load %arg2[%c0_1, %c0_2] : memref<128x128xbf16, #tpu.memory_space<vmem>>, vector<128x128xbf16>
    %c0_3 = arith.constant 0 : index
    %c0_4 = arith.constant 0 : index
    %2 = vector.load %arg3[%c0_3, %c0_4] : memref<1x128xf32, #tpu.memory_space<vmem>>, vector<1x128xf32>
    %cst = arith.constant dense<0.000000e+00> : vector<16x128xf32>
    %3 = tpu.matmul %0, %1, %cst {dimension_numbers = #tpu.dot_dimension_numbers<[1], [0], [0], [1], [0, 0, 1, 1], [], []>} : vector<16x128xbf16>, vector<128x128xbf16>, vector<16x128xf32> -> vector<16x128xf32>
    %4 = vector.broadcast %2 : vector<1x128xf32> to vector<16x128xf32>
    %5 = arith.addf %3, %4 : vector<16x128xf32>
    %cst_5 = arith.constant 0.000000e+00 : f32
    %6 = vector.broadcast %cst_5 : f32 to vector<16x128xf32>
    %7 = arith.maximumf %5, %6 : vector<16x128xf32>
    %c0_6 = arith.constant 0 : index
    %c0_7 = arith.constant 0 : index
    %8 = vector.load %arg4[%c0_6, %c0_7] : memref<128x128xbf16, #tpu.memory_space<vmem>>, vector<128x128xbf16>
    %c0_8 = arith.constant 0 : index
    %c0_9 = arith.constant 0 : index
    %9 = vector.load %arg5[%c0_8, %c0_9] : memref<1x128xf32, #tpu.memory_space<vmem>>, vector<1x128xf32>
    %10 = arith.truncf %7 : vector<16x128xf32> to vector<16x128xbf16>
    %cst_10 = arith.constant dense<0.000000e+00> : vector<16x128xf32>
    %11 = tpu.matmul %10, %8, %cst_10 {dimension_numbers = #tpu.dot_dimension_numbers<[1], [0], [0], [1], [0, 0, 1, 1], [], []>} : vector<16x128xbf16>, vector<128x128xbf16>, vector<16x128xf32> -> vector<16x128xf32>
    %12 = vector.broadcast %9 : vector<1x128xf32> to vector<16x128xf32>
    %13 = arith.addf %11, %12 : vector<16x128xf32>
    %cst_11 = arith.constant dense<0xFF800000> : vector<16xf32>
    %14 = vector.multi_reduction <maximumf>, %13, %cst_11 [1] : vector<16x128xf32> to vector<16xf32>
    %15 = vector.shape_cast %14 : vector<16xf32> to vector<16x1xf32>
    %16 = vector.broadcast %15 : vector<16x1xf32> to vector<16x128xf32>
    %17 = arith.subf %13, %16 : vector<16x128xf32>
    %18 = math.exp %17 : vector<16x128xf32>
    %cst_12 = arith.constant dense<0.000000e+00> : vector<16xf32>
    %19 = vector.multi_reduction <add>, %18, %cst_12 [1] : vector<16x128xf32> to vector<16xf32>
    %20 = vector.shape_cast %19 : vector<16xf32> to vector<16x1xf32>
    %21 = tpu.reciprocal %20 : vector<16x1xf32> -> vector<16x1xf32>
    %22 = vector.broadcast %21 : vector<16x1xf32> to vector<16x128xf32>
    %23 = arith.mulf %18, %22 : vector<16x128xf32>
    %c0_13 = arith.constant 0 : index
    %c0_14 = arith.constant 0 : index
    %24 = vector.load %arg6[%c0_13, %c0_14] : memref<16x128xf32, #tpu.memory_space<vmem>>, vector<16x128xf32>
    tpu.vector_store %arg6[%c0_13, %c0_14], %23 {strides = array<i32>} : memref<16x128xf32, #tpu.memory_space<vmem>>, vector<16x128xf32>,
    return
  }
  func.func @transform_0(%arg0: i32) -> (i32, i32) {
    %c0_i32 = arith.constant 0 : i32
    %c0_i32_0 = arith.constant 0 : i32
    return %arg0, %c0_i32 : i32, i32
  }
  func.func @transform_1(%arg0: i32) -> (i32, i32) {
    %c0_i32 = arith.constant 0 : i32
    %c0_i32_0 = arith.constant 0 : i32
    %c0_i32_1 = arith.constant 0 : i32
    return %c0_i32, %c0_i32_0 : i32, i32
  }
  func.func @transform_2(%arg0: i32) -> (i32, i32) {
    %c0_i32 = arith.constant 0 : i32
    %c0_i32_0 = arith.constant 0 : i32
    %c0_i32_1 = arith.constant 0 : i32
    return %c0_i32, %c0_i32_0 : i32, i32
  }
  func.func @transform_3(%arg0: i32) -> (i32, i32) {
    %c0_i32 = arith.constant 0 : i32
    %c0_i32_0 = arith.constant 0 : i32
    %c0_i32_1 = arith.constant 0 : i32
    return %c0_i32, %c0_i32_0 : i32, i32
  }
  func.func @transform_4(%arg0: i32) -> (i32, i32) {
    %c0_i32 = arith.constant 0 : i32
    %c0_i32_0 = arith.constant 0 : i32
    %c0_i32_1 = arith.constant 0 : i32
    return %c0_i32, %c0_i32_0 : i32, i32
  }
  func.func @transform_5(%arg0: i32) -> (i32, i32) {
    %c0_i32 = arith.constant 0 : i32
    %c0_i32_0 = arith.constant 0 : i32
    return %arg0, %c0_i32 : i32, i32
  }
}

</mosaic_0001>

<bundles_post_ra>
// kernel: mlp_forward.1
= control target key start
LH: loop header
LB: loop body
LE: loop exit
PB: predicated region body
PF: predicated region fallthrough
CT: control target
= control target key end

     0   :  { %10 = vsyncpa [#allocation3], 0  ;;  %s424_s18 = smov [#allocation2]   ;;  %s501_s0 = inlined_call_operand.vmem [shape: bf16[16,128], index: 0, kind: input, shape index: {}]   ;;  %s502_s1 = inlined_call_operand.vmem [shape: bf16[128,128], index: 1, kind: input, shape index: {}]   ;;  %s503_s2 = inlined_call_operand.vmem [shape: f32[1,128], index: 2, kind: input, shape index: {}]   ;;  %s504_s3 = inlined_call_operand.hbm [shape: bf16[128,128], index: 3, kind: input, shape index: {}]   ;;  %s505_s4 = inlined_call_operand.vmem [shape: f32[1,128], index: 4, kind: input, shape index: {}]   ;;  %s506_s5 = inlined_call_operand.vmem [shape: f32[16,128], index: 5, kind: output, shape index: {}]  }
   0x1   :  { %s22_s19 = sshll.u32 %s424_s18, 4  ;;  %s23_s19 = int_to_ptr.vmem [resolvable:$true] %s22_s19 }
   0x2   :  { %s410_s20 = scalar_lea.vmem %s23_s19, 1024  ;;  %p415_p1 = scmp.lt.s32.totalorder %s23_s19, %s23_s19 }
   0x3   :  { %p411_p0 = scmp.ne.s32.totalorder %s23_s19, %s410_s20  ;;  %p416_p2 = scmp.lt.s32.totalorder %s410_s20, %s410_s20 }
   0x5   :  { %p417_p3 = por %p416_p2, %p415_p1 }
   0x7   :  { %p418_p4 = pnand %p417_p3, %p411_p0 }
   0x9   :  { %421 = shalt.err (!%p418_p4)
}
   0xa   :  { %s425_s21 = smov 64   ;;  %s426_s22 = smov 4  }
   0xb   :  { %28 = dma.hbm_to_vmem [thread:$0]  %s504_s3, 1024, %s23_s19, [#allocation3], %s425_s21, %s425_s21, %s426_s22  }
   0xc   :  { %422 = dma.done.wait [#allocation3], 1024  }
   0xd   :  { %423 = vsyncadd [#allocation3], 4294966272  ;;  %v427_v0 = vmov 0.0   ;;  %vm428_vm0 = vmmov 0   ;;  %v377_v1 = vld [vmem:[%s502_s1 + $0x38] sm:$0xff]   ;;  %v378_v2 = vld [vmem:[%s502_s1 + $0x30] sm:$0xff]  }
   0xe   :  { %332 = vmatprep.subr.bf16.mxu0 %v427_v0  ;;  %348 = vmatprep.mubr.msk.bf16.mxu0 %vm428_vm0, %v427_v0  ;;  %v379_v3 = vld [vmem:[%s502_s1 + $0x28] sm:$0xff]   ;;  %v386_v4 = vld [vmem:[#allocation2 + $0x38] sm:$0xff]   ;;  %v380_v5 = vld [vmem:[%s502_s1 + $0x20] sm:$0xff]  }
   0xf   :  { %352 = vmatprep.subr.bf16.mxu1 %v427_v0  ;;  %368 = vmatprep.mubr.msk.bf16.mxu1 %vm428_vm0, %v427_v0  ;;  %v387_v6 = vld [vmem:[#allocation2 + $0x30] sm:$0xff]   ;;  %v381_v7 = vld [vmem:[%s502_s1 + $0x18] sm:$0xff]   ;;  %v388_v8 = vld [vmem:[#allocation2 + $0x28] sm:$0xff]  }
  0x10   :  { %333 = vmatpush3.bf16.msra.mxu0 %v377_v1  ;;  %353 = vmatpush3.bf16.msra.mxu1 %v386_v4  ;;  %v382_v9 = vld [vmem:[%s502_s1 + $0x10] sm:$0xff]   ;;  %v389_v10 = vld [vmem:[#allocation2 + $0x20] sm:$0xff]   ;;  %v383_v11 = vld [vmem:[%s502_s1 + $0x8] sm:$0xff]  }
  0x11   :  { %334 = vmatprep.subr.bf16.mxu0 %v427_v0  ;;  %354 = vmatprep.subr.bf16.mxu1 %v427_v0  ;;  %v390_v12 = vld [vmem:[#allocation2 + $0x18] sm:$0xff]   ;;  %v384_v13 = vld [vmem:[%s502_s1] sm:$0xff]   ;;  %v391_v15 = vld [vmem:[#allocation2 + $0x10] sm:$0xff]  }
  0x12   :  { %v385_v14 = vld [vmem:[%s501_s0] sm:$0xff]   ;;  %v392_v16 = vld [vmem:[#allocation2 + $0x8] sm:$0xff]  }
  0x13   :  { %v393_v17 = vld [vmem:[#allocation2] sm:$0xff]  }
  0x14   :  { %335 = vmatpush3.bf16.msra.mxu0 %v378_v2  ;;  %355 = vmatpush3.bf16.msra.mxu1 %v387_v6  ;;  %v295_v18 = vld [vmem:[%s503_s2] ss:$0 sm:$0xff] }
  0x15   :  { %336 = vmatprep.subr.bf16.mxu0 %v427_v0  ;;  %356 = vmatprep.subr.bf16.mxu1 %v427_v0  ;;  %v305_v28 = vld [vmem:[%s505_s4] ss:$0 sm:$0xff] }
  0x18   :  { %337 = vmatpush3.bf16.msra.mxu0 %v379_v3  ;;  %357 = vmatpush3.bf16.msra.mxu1 %v388_v8 }
  0x19   :  { %338 = vmatprep.subr.bf16.mxu0 %v427_v0  ;;  %358 = vmatprep.subr.bf16.mxu1 %v427_v0 }
  0x1c   :  { %339 = vmatpush3.bf16.msra.mxu0 %v380_v5  ;;  %359 = vmatpush3.bf16.msra.mxu1 %v389_v10 }
  0x1d   :  { %340 = vmatprep.subr.bf16.mxu0 %v427_v0  ;;  %360 = vmatprep.subr.bf16.mxu1 %v427_v0 }
  0x20   :  { %341 = vmatpush3.bf16.msra.mxu0 %v381_v7  ;;  %361 = vmatpush3.bf16.msra.mxu1 %v390_v12 }
  0x21   :  { %342 = vmatprep.subr.bf16.mxu0 %v427_v0  ;;  %362 = vmatprep.subr.bf16.mxu1 %v427_v0 }
  0x24   :  { %343 = vmatpush3.bf16.msra.mxu0 %v382_v9  ;;  %363 = vmatpush3.bf16.msra.mxu1 %v391_v15 }
  0x25   :  { %344 = vmatprep.subr.bf16.mxu0 %v427_v0  ;;  %364 = vmatprep.subr.bf16.mxu1 %v427_v0 }
  0x28   :  { %345 = vmatpush3.bf16.msra.mxu0 %v383_v11  ;;  %365 = vmatpush3.bf16.msra.mxu1 %v392_v16 }
  0x29   :  { %346 = vmatprep.subr.bf16.mxu0 %v427_v0  ;;  %366 = vmatprep.subr.bf16.mxu1 %v427_v0 }
  0x2c   :  { %347 = vmatpush3.bf16.msra.mxu0 %v384_v13  ;;  %367 = vmatpush3.bf16.msra.mxu1 %v393_v17 }
  0x2f   :  { %349 = vmatmul.mubr.bf16.vlgmr.msra.gmra.mxu0 %v385_v14 }
  0xef   :  { %v148_v19 = vpop.f32.mrf.mxu0 }
  0xf0   :  { %v149_v21 = vadd.f32 %v295_v18, %v148_v19 }
  0xf1   :  { %v350_v20 = vpop.f32.mrf.mxu0 }
  0xf2   :  { %v155_v25 = vmax.f32 %v149_v21, 0.0 }
  0xf3   :  { %v151_v22 = vpop.f32.mrf.mxu0 }
  0xf4   :  { %v152_v23 = vadd.f32 %v295_v18, %v151_v22 }
  0xf5   :  { %v351_v24 = vpop.f32.mrf.mxu0 }
  0xf6   :  { %v156_v26 = vmax.f32 %v152_v23, 0.0 }
  0xf8   :  { %v174_v27 = vpack.c.bf16 %v156_v26, %v155_v25 }
  0xfa   :  { %369 = vmatmul.mubr.bf16.vlgmr.msra.gmra.mxu1 %v174_v27 }
 0x1ba   :  { %v263_v29 = vpop.f32.mrf.mxu1 }
 0x1bb   :  { %v264_v30 = vadd.f32 %v305_v28, %v263_v29 }
 0x1bc   :  { %v370_v31 = vpop.f32.mrf.mxu1 }
 0x1bd   :  { %270 = vmax.xlane.f32.xlu0 %v264_v30 }
 0x1be   :  { %v266_v32 = vpop.f32.mrf.mxu1 }
 0x1bf   :  { %v267_v33 = vadd.f32 %v305_v28, %v266_v32 }
 0x1c0   :  { %v371_v34 = vpop.f32.mrf.mxu1 }
 0x1c1   :  { %272 = vmax.xlane.f32.xlu0 %v267_v33 }
 0x246   :  { %v271_v35 = vpop.xlane.xlu0 %270 }
 0x247   :  { %v274_v36 = vsub.f32 %v264_v30, %v271_v35 }
 0x249   :  { %v276_v37 = vmul.f32 1.442695, %v274_v36 }
 0x24a   :  { %v273_v38 = vpop.xlane.xlu0 %272 }
 0x24b   :  { %394 = vpow2.f32 %v276_v37  ;;  %v275_v39 = vsub.f32 %v267_v33, %v273_v38 }
 0x24d   :  { %v278_v40 = vmul.f32 1.442695, %v275_v39 }
 0x24f   :  { %396 = vpow2.f32 %v278_v40 }
 0x258   :  { %v395_v41 = vpop.eup %394 }
 0x259   :  { %280 = vadd.xlane.f32.xlu1 %v395_v41 }
 0x25c   :  { %v397_v42 = vpop.eup %396 }
 0x25d   :  { %282 = vadd.xlane.f32.xlu1 %v397_v42 }
 0x2e2   :  { %v281_v43 = vpop.xlane.xlu1 %280 }
 0x2e3   :  { %398 = vrcp.f32 %v281_v43 }
 0x2e6   :  { %v283_v44 = vpop.xlane.xlu1 %282 }
 0x2e7   :  { %400 = vrcp.f32 %v283_v44 }
 0x2f0   :  { %v399_v45 = vpop.eup %398 }
 0x2f1   :  { %v286_v46 = vmul.f32 %v399_v45, %v395_v41 }
 0x2f3   :  { %288 = vst [vmem:[%s506_s5] sm:$0xff] %v286_v46 }
 0x2f4   :  { %v401_v47 = vpop.eup %400 }
 0x2f5   :  { %v287_v48 = vmul.f32 %v401_v47, %v397_v42 }
 0x2f7   :  { %289 = vst [vmem:[%s506_s5 + $0x8] sm:$0xff] %v287_v48 }
 0x2f8   :  { %294 = vsyncpa [#allocation3], 1 }

</bundles_post_ra>
